<compile_context>
chip_gen: v7x
topology: tpu7x:2x2x1
jax: 0.10.0
libtpu: 0.0.40
codegen_flags: <defaults>
</compile_context>

<pallas_src>
import functools

import numpy as np
import jax
import jax.numpy as jnp
from jax import lax
from jax.experimental import pallas as pl
from jax.experimental.pallas import tpu as pltpu

POOL_SUM = 0
POOL_MEAN = 1

_SEM_POOL = 8      # rolling DMA-semaphore pool size (power of two)
_LANE = 128


def _merged_embbag_kernel(idx_sm, cnt_sm, coef_ref, scale_ref, w_hbm, out_ref,
                          gathered, sems, *, n_pad):
    """One grid step == one (already deduplicated) table.

    idx_sm   : SMEM (T, n_pad) int32 — unique global row ids into the merged weights.
    cnt_sm   : SMEM (T,)       int32 — number of valid (deduped) rows per table.
    coef_ref : VMEM (1, B, n_pad)    — per-bag multiplicity of each unique row
                                       (0 for padding), weight dtype.
    scale_ref: VMEM (1, B, 1) f32    — 1.0 for SUM, exact 1/bag_size for MEAN.
    w_hbm    : HBM  (sum_t V_t, D)   — merged weights, never copied wholesale.
    out_ref  : VMEM (1, B, D)        — pooled output block for this table.
    gathered : VMEM (n_pad, D)       — scratch for the DMA-gathered unique rows.
    sems     : (_SEM_POOL,) DMA semaphores — rolling pool.
    """
    t = pl.program_id(0)
    u = cnt_sm[t]                         # valid rows for THIS table (deduped count)

    # --- 1) Row gather: issue exactly `u` row DMAs (count-bounded, not n_pad). -----
    # All SMEM index reads happen here, before any .wait() below.
    def issue(i, carry):
        row = idx_sm[t, i]
        pltpu.make_async_copy(
            w_hbm.at[pl.ds(row, 1), :],
            gathered.at[pl.ds(i, 1), :],
            sems.at[i & (_SEM_POOL - 1)],
        ).start()
        return carry

    lax.fori_loop(0, u, issue, 0)

    # Drain: one row-sized wait per issued DMA.  The rolling pool keeps live semaphore
    # resources bounded while every transfer stays in flight concurrently.
    def drain(i, carry):
        pltpu.make_async_copy(
            w_hbm.at[pl.ds(0, 1), :],
            gathered.at[pl.ds(i, 1), :],
            sems.at[i & (_SEM_POOL - 1)],
        ).wait()
        return carry

    lax.fori_loop(0, u, drain, 0)

    # --- 2) Pooling: one (B, n_pad) x (n_pad, D) MXU matmul, f32 accumulation. ------
    rows = gathered[...]                                          # (n_pad, D)
    # Rows >= u were never DMA'd this step: select them to 0 so uninitialized VMEM
    # (possible NaN/Inf bit patterns) cannot reach the matmul (0 * NaN == NaN).
    row_ids = lax.broadcasted_iota(jnp.int32, (n_pad, rows.shape[-1]), 0)
    rows = jnp.where(row_ids < u, rows, jnp.zeros_like(rows))

    pooled = jnp.dot(coef_ref[0], rows,
                     preferred_element_type=jnp.float32)          # (B, D) f32
    out_ref[0] = (pooled * scale_ref[0]).astype(out_ref.dtype)    # exact MEAN scale


def pack_merged_tables(weights, dtype=None):
    """Pack the T tables ONCE, outside the per-call hot path.

    Row-concatenates the tables (optionally casting once, e.g. to bf16 to halve gather
    DMA traffic) and returns per-table row bases into the merged array.
    """
    table_sizes = [int(w.shape[0]) for w in weights]
    row_base = np.cumsum([0] + table_sizes[:-1]).astype(np.int64)
    w_cat = jnp.concatenate([jnp.asarray(w) for w in weights], axis=0)
    if dtype is not None:
        w_cat = w_cat.astype(dtype)
    return w_cat, row_base, table_sizes


def _pack_lookups(indices, offsets, row_base, table_sizes, batch, pooling_mode,
                  include_last_offset, coef_dtype):
    """Per-call host glue: dedup row ids, build coefficient/scale tensors, and order
    tables so a contiguous megacore split sees balanced DMA bytes."""
    T = len(indices)
    uniq_l, coef_l, scale_l = [], [], []
    for t in range(T):
        idx = np.asarray(indices[t]).astype(np.int64).reshape(-1)
        off = np.asarray(offsets[t]).astype(np.int64).reshape(-1)
        if not include_last_offset:
            off = np.concatenate([off, np.array([idx.shape[0]], np.int64)])
        sizes = np.diff(off)                                  # (batch,)
        used = idx[off[0]:off[-1]]
        bag_id = np.repeat(np.arange(batch), sizes)           # bag of each position
        # Out-of-range ids are clamped (PyTorch would raise; documented divergence).
        gid = np.clip(used, 0, table_sizes[t] - 1) + int(row_base[t])
        uniq, inv = np.unique(gid, return_inverse=True)       # sorted unique rows
        u = int(uniq.shape[0])
        coef = np.zeros((batch, max(u, 1)), np.float32)
        if used.shape[0] > 0:
            np.add.at(coef, (bag_id, inv), 1.0)               # multiplicity counts
        if pooling_mode == POOL_MEAN:
            scale = 1.0 / np.maximum(sizes.astype(np.float32), 1.0)   # exact divide
        else:
            scale = np.ones((batch,), np.float32)
        uniq_l.append(uniq.astype(np.int32))
        coef_l.append(coef)
        scale_l.append(scale)

    n_uni = [int(uq.shape[0]) for uq in uniq_l]
    n_pad = max(_LANE, ((max(n_uni + [1]) + _LANE - 1) // _LANE) * _LANE)

    IDX = np.zeros((T, n_pad), np.int32)
    CNT = np.zeros((T,), np.int32)
    COEF = np.zeros((T, batch, n_pad), np.float32)
    SCALE = np.zeros((T, batch, 1), np.float32)
    for t in range(T):
        u = n_uni[t]
        IDX[t, :u] = uniq_l[t]
        CNT[t] = u
        COEF[t, :, :coef_l[t].shape[1]] = coef_l[t]
        SCALE[t, :, 0] = scale_l[t]

    # v7x megacore: interleave heavy/light tables so any contiguous split of the grid
    # axis carries ~equal gather bytes.  Pure reordering; outputs un-permuted later.
    order_desc = list(np.argsort(np.asarray(n_uni))[::-1])
    perm = []
    lo, hi = 0, T - 1
    while lo <= hi:
        perm.append(order_desc[lo]); lo += 1
        if lo <= hi:
            perm.append(order_desc[hi]); hi -= 1
    perm = np.asarray(perm, np.int64)
    inv_perm = np.argsort(perm)

    IDX, CNT, COEF, SCALE = IDX[perm], CNT[perm], COEF[perm], SCALE[perm]
    return (jnp.asarray(IDX), jnp.asarray(CNT),
            jnp.asarray(COEF, coef_dtype), jnp.asarray(SCALE, jnp.float32),
            inv_perm, n_pad, int(np.sum(n_uni)))


def merged_embeddingbag_forward(w_cat, row_base, table_sizes, indices, offsets,
                                pooling_mode=POOL_SUM, include_last_offset=False):
    """JAX/Pallas equivalent of torch.ops.torch_ipex.merged_embeddingbag_forward.

    Returns a list of T arrays of shape (batch, D), one per table, in the packed
    weight dtype.
    """
    T = len(indices)
    assert T == len(table_sizes) == len(offsets) and T > 0
    D = int(w_cat.shape[1])
    batch = int(offsets[0].shape[0]) - (1 if include_last_offset else 0)
    assert all(int(o.shape[0]) == int(offsets[0].shape[0]) for o in offsets), \
        "all tables must share the same batch"

    # TODO(synk): per-call host packing (dedup + coefficient build) assumes host-side
    # index streams (DLRM-style); device-resident indices would need an on-device
    # preprocessing kernel, and very large per-table index sets should stream row ids
    # through VMEM chunks instead of one big SMEM prefetch.
    IDX, CNT, COEF, SCALE, inv_perm, n_pad, total_rows = _pack_lookups(
        indices, offsets, row_base, table_sizes, batch, pooling_mode,
        include_last_offset, w_cat.dtype)

    kernel = functools.partial(_merged_embbag_kernel, n_pad=n_pad)

    itemsize = int(np.dtype(w_cat.dtype).itemsize)
    cost = pl.CostEstimate(
        flops=2 * T * batch * n_pad * D,
        transcendentals=0,
        bytes_accessed=int(total_rows * D * itemsize        # row gather (dominant)
                           + COEF.size * itemsize           # coefficients
                           + T * batch * D * itemsize       # outputs
                           + IDX.size * 4 + SCALE.size * 4))

    # TODO(synk): cross-grid-step double buffering (prefetch table t+1's rows during
    # table t's matmul) needs dimension_semantics=("arbitrary",) — priming/guarding on
    # program_id==0 deadlocks under a megacore grid split — so it is intentionally
    # omitted in favour of the v7x "parallel" table split.
    # TODO(synk): bf16 tables halve gather bytes and hit the bf16-native MXU, but
    # single-row sub-32-bit DMAs need the lane-pair uint32 packing (pltpu.bitcast)
    # trick before enabling them here; with f32 tables the pooling dot takes the
    # slower multi-pass f32 MXU path (negligible at this size).
    out = pl.pallas_call(
        kernel,
        out_shape=jax.ShapeDtypeStruct((T, batch, D), w_cat.dtype),
        grid_spec=pltpu.PrefetchScalarGridSpec(
            num_scalar_prefetch=2,                 # IDX, CNT -> SMEM (drive row DMAs)
            grid=(T,),                             # one step per table; no cat/copy step
            in_specs=[
                pl.BlockSpec((1, batch, n_pad), lambda t, idx, cnt: (t, 0, 0)),  # COEF
                pl.BlockSpec((1, batch, 1), lambda t, idx, cnt: (t, 0, 0)),      # SCALE
                pl.BlockSpec(memory_space=pl.ANY),                               # weights (HBM)
            ],
            out_specs=pl.BlockSpec((1, batch, D), lambda t, idx, cnt: (t, 0, 0)),
            scratch_shapes=[
                pltpu.VMEM((n_pad, D), w_cat.dtype),     # gathered unique rows
                pltpu.SemaphoreType.DMA((_SEM_POOL,)),   # rolling DMA-sem pool
            ],
        ),
        compiler_params=pltpu.CompilerParams(
            dimension_semantics=("parallel",),     # v7x: shard tables over both TCs
            vmem_limit_bytes=32 * 1024 * 1024,
        ),
        cost_estimate=cost,
    )(IDX, CNT, COEF, SCALE, w_cat)

    return [out[int(inv_perm[t])] for t in range(T)]


def _ref_forward(weights, indices, offsets, pooling_mode, include_last_offset):
    outs = []
    for t in range(len(weights)):
        w = np.asarray(weights[t], np.float32)
        idx = np.asarray(indices[t])
        off = np.asarray(offsets[t])
        if not include_last_offset:
            off = np.concatenate([off, [len(idx)]])
        B = len(off) - 1
        o = np.zeros((B, w.shape[1]), np.float32)
        for b in range(B):
            s, e = int(off[b]), int(off[b + 1])
            if e > s:
                vals = w[idx[s:e]]
                o[b] = vals.sum(0) if pooling_mode == POOL_SUM else vals.mean(0)
        outs.append(o)
    return outs


if __name__ == "__main__":
    key = jax.random.PRNGKey(0)
    keys = jax.random.split(key, 16)

    B, D, T = 8, 128, 3
    num_embeddings = [40, 64, 50]

    # Weights rounded through bf16 so the SUM check stays tight regardless of how the
    # MXU decomposes the f32 pooling matmul (bf16-representable operands are exact).
    weights = [
        (0.1 * jax.random.normal(keys[i], (num_embeddings[i], D), jnp.float32)
         ).astype(jnp.bfloat16).astype(jnp.float32)
        for i in range(T)
    ]

    # Deterministic bags (offsets of length B, include_last_offset=False style).
    bag_sizes = [
        [2, 1, 3, 0, 2, 4, 1, 2],
        [1, 1, 1, 1, 1, 1, 1, 1],
        [3, 2, 0, 1, 4, 2, 2, 1],
    ]
    # Table 0 draws from a tiny id range so duplicate rows (within and across bags)
    # exercise the dedup-with-multiplicity path.
    id_range = [5, num_embeddings[1], num_embeddings[2]]
    indices, offsets = [], []
    for t in range(T):
        sizes = bag_sizes[t]
        n = int(sum(sizes))
        idx_t = jax.random.randint(keys[4 + t], (n,), 0, id_range[t], dtype=jnp.int32)
        off_t = jnp.array(np.cumsum([0] + sizes[:-1]), dtype=jnp.int32)
        indices.append(idx_t)
        offsets.append(off_t)

    # Pack the tables once, outside the hot path.
    w_cat, row_base, table_sizes = pack_merged_tables(weights)

    # --- SUM pooling ---------------------------------------------------------------
    outs = merged_embeddingbag_forward(w_cat, row_base, table_sizes, indices, offsets,
                                       pooling_mode=POOL_SUM, include_last_offset=False)
    outs = jax.block_until_ready(outs)
    refs = _ref_forward(weights, indices, offsets, POOL_SUM, False)
    for t in range(T):
        assert outs[t].shape == (B, D)
        np.testing.assert_allclose(np.asarray(outs[t]), refs[t], rtol=1e-5, atol=1e-5)

    # --- MEAN pooling (exact host-side 1/count -> tight tolerance) ------------------
    outs_m = merged_embeddingbag_forward(w_cat, row_base, table_sizes, indices, offsets,
                                         pooling_mode=POOL_MEAN, include_last_offset=False)
    outs_m = jax.block_until_ready(outs_m)
    refs_m = _ref_forward(weights, indices, offsets, POOL_MEAN, False)
    for t in range(T):
        np.testing.assert_allclose(np.asarray(outs_m[t]), refs_m[t], rtol=1e-5, atol=1e-5)

    print("KERNEL_OK")
</pallas_src>

<mosaic_0001>
module attributes {stable_mosaic.version = 11 : i64} {
  func.func @_merged_embbag_kernel(%arg0: i32, %arg1: memref<3x128xi32, #tpu.memory_space<smem>>, %arg2: memref<3xi32, #tpu.memory_space<smem>>, %arg3: memref<1x8x128xf32, #tpu.memory_space<vmem>>, %arg4: memref<1x8x1xf32, #tpu.memory_space<vmem>>, %arg5: memref<154x128xf32, #tpu.memory_space<any>>, %arg6: memref<1x8x128xf32, #tpu.memory_space<vmem>>, %arg7: memref<128x128xf32, #tpu.memory_space<vmem>>, %arg8: memref<8x!tpu.dma_semaphore, #tpu.memory_space<semaphore_mem>>) attributes {dimension_semantics = [#tpu.dimension_semantics<parallel>], iteration_bounds = array<i64: 3>, scalar_prefetch = 2 : i64, scratch_operands = 2 : i64, tpu.core_type = #tpu.core_type<tc>, window_params = [{transform_indices = @transform_0, window_bounds = array<i64: 1, 8, 128>}, {transform_indices = @transform_1, window_bounds = array<i64: 1, 8, 1>}, {}, {transform_indices = @transform_3, window_bounds = array<i64: 1, 8, 128>}]} {
    %0 = arith.index_cast %arg0 : i32 to index
    %1 = memref.load %arg2[%0] : memref<3xi32, #tpu.memory_space<smem>>
    %c0_i32 = arith.constant 0 : i32
    %c0_i32_0 = arith.constant 0 : i32
    %2 = arith.subi %1, %c0_i32_0 : i32
    %3 = arith.addi %c0_i32_0, %2 : i32
    %c1_i32 = arith.constant 1 : i32
    scf.for %arg9 = %c0_i32_0 to %3 step %c1_i32  : i32 {
      %22 = arith.index_cast %arg0 : i32 to index
      %23 = arith.index_cast %arg9 : i32 to index
      %24 = memref.load %arg1[%22, %23] : memref<3x128xi32, #tpu.memory_space<smem>>
      %c7_i32 = arith.constant 7 : i32
      %25 = arith.andi %arg9, %c7_i32 : i32
      %c0_i32_15 = arith.constant 0 : i32
      %26 = tpu.memref_slice %arg5[%24, %c0_i32_15] : memref<154x128xf32, #tpu.memory_space<any>> -> memref<1x128xf32, #tpu.memory_space<any>>
      %c0_i32_16 = arith.constant 0 : i32
      %27 = tpu.memref_slice %arg7[%arg9, %c0_i32_16] : memref<128x128xf32, #tpu.memory_space<vmem>> -> memref<1x128xf32, #tpu.memory_space<vmem>>
      %28 = tpu.memref_slice %arg8[%25] : memref<8x!tpu.dma_semaphore, #tpu.memory_space<semaphore_mem>> -> memref<1x!tpu.dma_semaphore, #tpu.memory_space<semaphore_mem>>
      %29 = tpu.memref_squeeze %28 : memref<1x!tpu.dma_semaphore, #tpu.memory_space<semaphore_mem>> -> memref<!tpu.dma_semaphore, #tpu.memory_space<semaphore_mem>>
      tpu.enqueue_dma source(%26 : memref<1x128xf32, #tpu.memory_space<any>>) target(%27 : memref<1x128xf32, #tpu.memory_space<vmem>>) target_semaphore(%29 : memref<!tpu.dma_semaphore, #tpu.memory_space<semaphore_mem>>)
    }
    %c0_i32_1 = arith.constant 0 : i32
    %c0_i32_2 = arith.constant 0 : i32
    %4 = arith.subi %1, %c0_i32_2 : i32
    %5 = arith.addi %c0_i32_2, %4 : i32
    %c1_i32_3 = arith.constant 1 : i32
    scf.for %arg9 = %c0_i32_2 to %5 step %c1_i32_3  : i32 {
      %c7_i32 = arith.constant 7 : i32
      %22 = arith.andi %arg9, %c7_i32 : i32
      %c0_i32_15 = arith.constant 0 : i32
      %c0_i32_16 = arith.constant 0 : i32
      %23 = tpu.memref_slice %arg5[%c0_i32_15, %c0_i32_16] : memref<154x128xf32, #tpu.memory_space<any>> -> memref<1x128xf32, #tpu.memory_space<any>>
      %c0_i32_17 = arith.constant 0 : i32
      %24 = tpu.memref_slice %arg7[%arg9, %c0_i32_17] : memref<128x128xf32, #tpu.memory_space<vmem>> -> memref<1x128xf32, #tpu.memory_space<vmem>>
      %25 = tpu.memref_slice %arg8[%22] : memref<8x!tpu.dma_semaphore, #tpu.memory_space<semaphore_mem>> -> memref<1x!tpu.dma_semaphore, #tpu.memory_space<semaphore_mem>>
      %26 = tpu.memref_squeeze %25 : memref<1x!tpu.dma_semaphore, #tpu.memory_space<semaphore_mem>> -> memref<!tpu.dma_semaphore, #tpu.memory_space<semaphore_mem>>
      tpu.wait_dma2 semaphore(%26 : memref<!tpu.dma_semaphore, #tpu.memory_space<semaphore_mem>>) src(%23 : memref<1x128xf32, #tpu.memory_space<any>>) dst(%24 : memref<1x128xf32, #tpu.memory_space<vmem>>)
    }
    %c0 = arith.constant 0 : index
    %c0_4 = arith.constant 0 : index
    %6 = vector.load %arg7[%c0, %c0_4] : memref<128x128xf32, #tpu.memory_space<vmem>>, vector<128x128xf32>
    %7 = tpu.iota {dimensions = array<i32: 0>} : vector<128x128xi32>
    %8 = vector.broadcast %1 : i32 to vector<128x128xi32>
    %9 = arith.cmpi slt, %7, %8 : vector<128x128xi32>
    %cst = arith.constant 0.000000e+00 : f32
    %10 = vector.broadcast %cst : f32 to vector<128x128xf32>
    %11 = arith.select %9, %6, %10 : vector<128x128xi1>, vector<128x128xf32>
    %c0_5 = arith.constant 0 : index
    %c0_6 = arith.constant 0 : index
    %c0_7 = arith.constant 0 : index
    %12 = vector.load %arg3[%c0_5, %c0_6, %c0_7] : memref<1x8x128xf32, #tpu.memory_space<vmem>>, vector<1x8x128xf32>
    %13 = vector.shape_cast %12 : vector<1x8x128xf32> to vector<8x128xf32>
    %cst_8 = arith.constant dense<0.000000e+00> : vector<8x128xf32>
    %14 = tpu.matmul %13, %11, %cst_8 {dimension_numbers = #tpu.dot_dimension_numbers<[1], [0], [0], [1], [0, 0, 1, 1], [], []>} : vector<8x128xf32>, vector<128x128xf32>, vector<8x128xf32> -> vector<8x128xf32>
    %c0_9 = arith.constant 0 : index
    %c0_10 = arith.constant 0 : index
    %c0_11 = arith.constant 0 : index
    %15 = vector.load %arg4[%c0_9, %c0_10, %c0_11] : memref<1x8x1xf32, #tpu.memory_space<vmem>>, vector<1x8x1xf32>
    %16 = vector.shape_cast %15 : vector<1x8x1xf32> to vector<8x1xf32>
    %17 = vector.broadcast %16 : vector<8x1xf32> to vector<8x128xf32>
    %18 = arith.mulf %14, %17 : vector<8x128xf32>
    %c0_12 = arith.constant 0 : index
    %c0_13 = arith.constant 0 : index
    %c0_14 = arith.constant 0 : index
    %19 = vector.load %arg6[%c0_12, %c0_13, %c0_14] : memref<1x8x128xf32, #tpu.memory_space<vmem>>, vector<1x8x128xf32>
    %20 = vector.shape_cast %19 : vector<1x8x128xf32> to vector<8x128xf32>
    %21 = vector.shape_cast %18 : vector<8x128xf32> to vector<1x8x128xf32>
    tpu.vector_store %arg6[%c0_12, %c0_13, %c0_14], %21 {strides = array<i32>} : memref<1x8x128xf32, #tpu.memory_space<vmem>>, vector<1x8x128xf32>,
    return
  }
  func.func @transform_0(%arg0: i32, %arg1: memref<3x128xi32, #tpu.memory_space<smem>>, %arg2: memref<3xi32, #tpu.memory_space<smem>>) -> (i32, i32, i32) {
    %c0_i32 = arith.constant 0 : i32
    %c0_i32_0 = arith.constant 0 : i32
    %c0_i32_1 = arith.constant 0 : i32
    return %arg0, %c0_i32, %c0_i32_0 : i32, i32, i32
  }
  func.func @transform_1(%arg0: i32, %arg1: memref<3x128xi32, #tpu.memory_space<smem>>, %arg2: memref<3xi32, #tpu.memory_space<smem>>) -> (i32, i32, i32) {
    %c0_i32 = arith.constant 0 : i32
    %c0_i32_0 = arith.constant 0 : i32
    %c0_i32_1 = arith.constant 0 : i32
    return %arg0, %c0_i32, %c0_i32_0 : i32, i32, i32
  }
  func.func @transform_3(%arg0: i32, %arg1: memref<3x128xi32, #tpu.memory_space<smem>>, %arg2: memref<3xi32, #tpu.memory_space<smem>>) -> (i32, i32, i32) {
    %c0_i32 = arith.constant 0 : i32
    %c0_i32_0 = arith.constant 0 : i32
    %c0_i32_1 = arith.constant 0 : i32
    return %arg0, %c0_i32, %c0_i32_0 : i32, i32, i32
  }
}

</mosaic_0001>

<bundles_post_ra>
// kernel: tpu_custom_call.1
= control target key start
LH: loop header
LB: loop body
LE: loop exit
PB: predicated region body
PF: predicated region fallthrough
CT: control target
= control target key end

     0   :  { %s1069_s0 = inlined_call_operand.vmem [shape: s32[3,128], index: 0, kind: input, shape index: {}]   ;;  %s1070_s2 = inlined_call_operand.vmem [shape: f32[3,8,128], index: 2, kind: input, shape index: {}]   ;;  %s1071_s3 = inlined_call_operand.vmem [shape: f32[3,8,1], index: 3, kind: input, shape index: {}]   ;;  %s1072_s4 = inlined_call_operand.hbm [shape: f32[154,128], index: 4, kind: input, shape index: {}]   ;;  %s1073_s5 = inlined_call_operand.hbm [shape: f32[3,8,128], index: 5, kind: output, shape index: {}]   ;;  %s1074_s1 = inlined_call_operand.vmem [shape: s32[3], index: 1, kind: input, shape index: {}]  }
   0x1   :  { %1080 = sst [smem:[#allocation19_spill]] %s1070_s2  ;;  %s10_s20 = sshll.u32 %s1069_s0, 4  ;;  %s11_s20 = int_to_ptr.vmem [resolvable:$true] %s10_s20 }
   0x2   :  { %1081 = sst [smem:[#allocation20_spill]] %s1071_s3  ;;  %s14_s23 = sshll.u32 %s1074_s1, 4  ;;  %s15_s23 = int_to_ptr.vmem [resolvable:$true] %s14_s23 }
   0x3   :  { %s696_s24 = scalar_lea.vmem %s11_s20, 64  ;;  %p701_p1 = scmp.lt.s32.totalorder %s11_s20, %s11_s20 }
   0x4   :  { %p697_p0 = scmp.ne.s32.totalorder %s11_s20, %s696_s24  ;;  %p702_p2 = scmp.lt.s32.totalorder %s696_s24, %s696_s24 }
   0x6   :  { %p703_p3 = por %p702_p2, %p701_p1 }
   0x8   :  { %p704_p4 = pnand %p703_p3, %p697_p0 }
   0xa   :  { %707 = shalt.err (!%p704_p4)  }
   0xb   :  { %s828_s25 = smov [#allocation5]   ;;  %s708_s26 = scalar_lea.vmem %s15_s23, 16 }
   0xc   :  { %13 = dma.vmem_to_smem %s11_s20, 64, %s828_s25, [#allocation4] }
   0xd   :  { %p709_p5 = scmp.ne.s32.totalorder %s15_s23, %s708_s26  ;;  %p713_p6 = scmp.lt.s32.totalorder %s15_s23, %s15_s23 }
   0xe   :  { %p714_p7 = scmp.lt.s32.totalorder %s708_s26, %s708_s26 }
  0x10   :  { %p715_p8 = por %p714_p7, %p713_p6 }
  0x12   :  { %p716_p9 = pnand %p715_p8, %p709_p5 }
  0x14   :  { %719 = shalt.err (!%p716_p9)  }
  0x15   :  { %s829_s0 = smov [#allocation6]  }
  0x16   :  { %17 = dma.vmem_to_smem %s15_s23, 16, %s829_s0, [#allocation4] }
  0x17   :  { %796 = dma.done.wait [#allocation4], 80 }
  0x18   :  { %797 = vsyncadd [#allocation4], 4294967216 }
  0x19   :  { %19 = sfence }
  0x1a   :  { %20 = vsyncpa [#allocation8], 0 }
  0x1b   :  { %22 = vsyncpa [#allocation8 + $0x1], 0  ;;  %s872_s1 = smov 0   ;;  %s874_s27 = smov 0  }
  0x1c   :  { %s876_s28 = smov 0   ;;  %s878_s29 = smov 0  }
  0x1d LB: > { %1082 = sst [smem:[#allocation16_spill]] %s814_s28  ;;  %s893_s30 = sadd.s32 4294967295, %s818_s29   ;;  %s818_s29 = sphi %s878_s29, %s1093_s29   ;;  %s814_s28 = sphi %s876_s28, %s1095_s28   ;;  %s810_s27 = sphi %s874_s27, %s1097_s27   ;;  %s806_s1 = sphi %s872_s1, %s1096_s1  }
  0x1e   : > { %s511_s6 = sadd.s32 4294967294, %s818_s29   ;;  %s897_s7 = sadd.s32 1, %s818_s29  }
  0x1f   : > { %1083 = sst [smem:[#allocation17_spill]] %s897_s7  ;;  %s87_s8 = sadd.s32 1, %s814_s28 }
  0x20   : > { %s84_s9 = ssub.s32 %s818_s29, %s897_s7  ;;  %p97_p10 = scmp.ne.s32.totalorder %s814_s28, %s810_s27 }
  0x21   : > { %p85_p11 = scmp.eq.s32.totalorder %s84_s9, 0  ;;  %p98_p12 = scmp.eq.s32.totalorder %s893_s30, 2 }
  0x22   : > { %p103_p13 = scmp.ne.s32.totalorder %s810_s27, %s806_s1  ;;  %p104_p0 = scmp.eq.s32.totalorder %s511_s6, 2 }
  0x23   : > { %s908_s10 = scalar_select %p85_p11, %s814_s28, %s87_s8  }
  0x24   : > { %p910_p1 = por %p98_p12, %p97_p10  ;;  %p914_p2 = por %p104_p0, %p103_p13 }
  0x25   : > { %1084 = sst [smem:[#allocation18_spill]] %s908_s10  ;;  %p514_p3 = scmp.ge.s32.totalorder %s818_s29, 1 }
  0x26   : > { %p136_p4 = scmp.lt.s32.totalorder %s818_s29, 4 }
  0x28   : > { %p137_p5 = pnand %p514_p3, %p136_p4 }
  0x29   : > { %s1075_s13 = sand.u32 (!%p137_p5), 1, %s810_s27   ;;  %p161_p6 = scmp.lt.s32.totalorder (!%p137_p5), %s893_s30, 2 }
  0x2a   : > { %140 = sbr.rel (%p137_p5) target bundleno = 392 (0x188), region = 28  ;;  %s924_s14 = sshll.u32 (!%p137_p5), %s1075_s13, 3 }
  0x2b   : > { %s927_s15 = sld [smem:[#allocation6 + %s893_s30]] (!%p137_p5) }
  0x2c   : > { %s1087_s2 = sld [smem:[#allocation19_spill]] (!%p137_p5)  ;;  %s1088_s3 = sld [smem:[#allocation20_spill]] (!%p137_p5) }
  0x31   : > { %s162_s16 = scalar_select %p161_p6, %s893_s30, 2 }
  0x32   : > { %p1079_p7 = scmp.le.s32.totalorder %s927_s15, 0 }
  0x33   : > { %s516_s17 = sshll.u32 %s162_s16, 3  ;;  %s944_s25 = smov (!%p1079_p7), 0  }
  0x34   : > { %s933_s20 = scalar_lea.vmem %s1087_s2, %s516_s17  ;;  %s938_s23 = scalar_lea.vmem %s1088_s3, %s516_s17 }
  0x35   : > { %476 = sbr.rel (%p1079_p7) target bundleno = 103 (0x67), region = 89 }
  0x3c LB: >> { %s176_s26 = sshra.s32 %s822_s25, 7  ;;  %s181_s0 = sand.u32 127, %s822_s25  ;;  %s822_s25 = sphi %s944_s25, %s173_s25  }
  0x3d   : >> { %s178_s6 = sadd.s32 %s893_s30, %s176_s26  ;;  %s184_s17 = sand.u32 7, %s822_s25 }
  0x3e   : >> { %s519_s8 = sshll.u32 %s178_s6, 7  ;;  %s187_s18 = scalar_lea.vmem [#allocation2], %s822_s25 }
  0x3f   : >> { %s182_s9 = sadd.s32 %s519_s8, %s181_s0  ;;  %s196_s19 = sshll.u32 %s187_s18, 4  ;;  %s197_s19 = int_to_ptr.vmem [resolvable:$true] %s196_s19 }
  0x40   : >> { %s183_s16 = sld [smem:[#allocation5 + %s182_s9]]  ;;  %s188_s2 = scalar_lea.sflag [#allocation3], %s184_s17 }
  0x41   : >> { %s722_s7 = scalar_lea.hbm %s1072_s4, 2560 }
  0x46   : >> { %s520_s21 = sshll.u32 %s183_s16, 4 }
  0x47   : >> { %s186_s24 = scalar_lea.hbm %s1072_s4, %s520_s21 }
  0x48   : >> { %s720_s3 = scalar_lea.hbm %s186_s24, 16  ;;  %p723_p9 = scmp.lt.u32.totalorder %s186_s24, %s1072_s4 }
  0x49   : >> { %p721_p8 = scmp.ne.s32.totalorder %s186_s24, %s720_s3  ;;  %p724_p10 = scmp.lt.u32.totalorder %s722_s7, %s720_s3 }
  0x4a   : >> { %p726_p12 = scmp.lt.u32.totalorder %s720_s3, %s186_s24 }
  0x4b   : >> { %p725_p11 = por %p724_p10, %p723_p9 }
  0x4d   : >> { %p727_p13 = por %p726_p12, %p725_p11 }
  0x4f   : >> { %p728_p0 = pnand %p727_p13, %p721_p8 }
  0x51   : >> { %731 = shalt.err (!%p728_p0)  }
  0x52   : >> { %s732_s0 = scalar_lea.vmem %s197_s19, 16  ;;  %s830_s13 = smov [#allocation2]  }
  0x53   : >> { %p733_p3 = scmp.ne.s32.totalorder %s197_s19, %s732_s0  ;;  %s734_s8 = sshll.u32 %s830_s13, 4  ;;  %s735_s8 = int_to_ptr.vmem [resolvable:$false] %s734_s8 }
  0x54   : >> { %s736_s9 = scalar_lea.vmem %s735_s8, 2048  ;;  %p737_p4 = scmp.lt.s32.totalorder %s197_s19, %s735_s8 }
  0x55   : >> { %p738_p5 = scmp.lt.s32.totalorder %s736_s9, %s732_s0 }
  0x57   : >> { %p739_p6 = por %p738_p5, %p737_p4 }
  0x59   : >> { %p740_p7 = pnand %p739_p6, %p733_p3 }
  0x5b   : >> { %743 = shalt.err (!%p740_p7)  }
  0x5c   : >> { %199 = dma.hbm_to_vmem [thread:$0]  %s186_s24, 16, %s197_s19, %s188_s2 }
  0x5d   : >> { %s173_s25 = sadd.s32 1, %s822_s25  }
  0x5e   : >> { %p172_p9 = scmp.ge.s32.totalorder %s173_s25, %s927_s15 }
  0x60   : > { %175 = sbr.rel (!%p172_p9) target bundleno = 60 (0x3c), region = 95 }
  0x67 PF: > { %p1089_p8 = scmp.le.s32.totalorder %s927_s15, 0 }
  0x68   : > { %s824_s3 = smov (!%p1089_p8), 0  }
  0x69   : > { %481 = sbr.rel (%p1089_p8) target bundleno = 125 (0x7d), region = 100 }
  0x70 LB: >> { %s206_s28 = sand.u32 7, %s826_s3  ;;  %s826_s3 = sphi %s824_s3, %s203_s3  }
  0x71   : >> { %s207_s7 = scalar_lea.sflag [#allocation3], %s206_s28 }
  0x72   : >> { %798 = dma.done.wait %s207_s7, 16 }
  0x73   : >> { %799 = vsyncadd %s207_s7, 4294967280  ;;  %s203_s3 = sadd.s32 1, %s826_s3  }
  0x74   : >> { %p202_p7 = scmp.ge.s32.totalorder %s203_s3, %s927_s15 }
  0x76   : > { %205 = sbr.rel (!%p202_p7) target bundleno = 112 (0x70), region = 106 }
  0x7d PF: > { %v211_v0 = vld [vmem:[#allocation2] sm:$0xff]  ;;  %v212_v1 = vld [vmem:[#allocation2 + $0x8] sm:$0xff]  ;;  %v227_v2 = vlaneseq  ;;  %v831_v3 = vmov 0.0|0.0   ;;  %v972_v4 = vstv %s927_s15  ;;  %vm832_vm0 = vmmov 0   ;;  %v213_v12 = vld [vmem:[#allocation2 + $0x10] sm:$0xff]  ;;  %s539_s2 = sshll.u32 %s893_s30, 7 }
  0x7e   : > { %602 = vmatprep.subr.bf16.mxu0 %v831_v3  ;;  %v833_v6 = vmov 0.0   ;;  %v834_v7 = vmov 0   ;;  %v603_v8 = vpack.c.bf16 %v212_v1, %v211_v0  ;;  %v214_v13 = vld [vmem:[#allocation2 + $0x18] sm:$0xff]  ;;  %v348_v16 = vld [vmem:[%s938_s23] sm:$0xff]  ;;  %v216_v19 = vld [vmem:[#allocation2 + $0x28] sm:$0xff]  ;;  %s1090_s10 = scalar_lea.vmem [#allocation7], %s924_s14  ;;  %s1023_s25 = scalar_lea.hbm %s1073_s5, %s539_s2 }
  0x7f   : > { %v974_v5 = vshrl.u32 %v227_v2, 7  ;;  %599 = vmatprep.mubr.msk.f32.mxu0 %vm832_vm0, %v833_v6  ;;  %695 = vset.pattern.permute.xlu0 %v834_v7  ;;  %v607_v17 = vpack.c.bf16 %v214_v13, %v213_v12  ;;  %v215_v18 = vld [vmem:[#allocation2 + $0x20] sm:$0xff]  ;;  %v217_v23 = vld [vmem:[#allocation2 + $0x30] sm:$0xff]  ;;  %v218_v24 = vld [vmem:[#allocation2 + $0x38] sm:$0xff]  ;;  %s370_s15 = sshll.u32 %s1090_s10, 4  ;;  %s1091_s16 = smov %s1090_s10  ;;  %s1025_s15 = int_to_ptr.vmem [resolvable:$true] %s370_s15 }
  0x80   : > { %351 = vperm.xlu0 %695, %v348_v16   ;;  %v611_v22 = vpack.c.bf16 %v216_v19, %v215_v18  ;;  %v615_v27 = vpack.c.bf16 %v218_v24, %v217_v23  ;;  %v219_v28 = vld [vmem:[#allocation2 + $0x40] sm:$0xff]  ;;  %v220_v29 = vld [vmem:[#allocation2 + $0x48] sm:$0xff]  ;;  %v221_v33 = vld [vmem:[#allocation2 + $0x50] sm:$0xff]  ;;  %s744_s30 = scalar_lea.vmem %s1025_s15, 128  ;;  %s835_s18 = smov [#allocation7]  }
  0x81   : > { %v229_v9 = vadd.s32 8, %v974_v5  ;;  %vm245_vm1 = vcmp.lt.s32.totalorder %v974_v5, %v972_v4  ;;  %v230_v10 = vadd.s32 16, %v974_v5  ;;  %v231_v11 = vadd.s32 24, %v974_v5  ;;  %v222_v34 = vld [vmem:[#allocation2 + $0x58] sm:$0xff]  ;;  %v223_v38 = vld [vmem:[#allocation2 + $0x60] sm:$0xff]  ;;  %v224_v39 = vld [vmem:[#allocation2 + $0x68] sm:$0xff]  ;;  %p745_p10 = scmp.ne.s32.totalorder %s1025_s15, %s744_s30 }
  0x82   : > { %v232_v14 = vadd.s32 32, %v974_v5  ;;  %v233_v15 = vadd.s32 40, %v974_v5  ;;  %v234_v20 = vadd.s32 48, %v974_v5  ;;  %v235_v21 = vadd.s32 56, %v974_v5  ;;  %v225_v43 = vld [vmem:[#allocation2 + $0x70] sm:$0xff]  ;;  %v226_v44 = vld [vmem:[#allocation2 + $0x78] sm:$0xff] }
  0x83   : > { %vm246_vm2 = vcmp.lt.s32.totalorder %v229_v9, %v972_v4  ;;  %vm247_vm3 = vcmp.lt.s32.totalorder %v230_v10, %v972_v4  ;;  %vm248_vm4 = vcmp.lt.s32.totalorder %v231_v11, %v972_v4  ;;  %v236_v25 = vadd.s32 64, %v974_v5  ;;  %v277_v46 = vld [vmem:[%s933_s20] sm:$0xff]  ;;  %s1092_s20 = sand.u32 1, %s810_s27   ;;  %p746_p11 = pnand %p745_p10, %p910_p1 }
  0x84   : > { %vm604_vm5 = vmpackc.low %vm246_vm2, %vm245_vm1  ;;  %vm249_vm7 = vcmp.lt.s32.totalorder %v232_v14, %v972_v4  ;;  %vm250_vm8 = vcmp.lt.s32.totalorder %v233_v15, %v972_v4  ;;  %vm251_vm10 = vcmp.lt.s32.totalorder %v234_v20, %v972_v4  ;;  %vm252_vm11 = vcmp.lt.s32.totalorder %v235_v21, %v972_v4  ;;  %s357_s17 = scalar_lea.sflag [#allocation8], %s1092_s20  ;;  %s748_s19 = sshll.u32 %s835_s18, 4  ;;  %s749_s19 = int_to_ptr.vmem [resolvable:$false] %s748_s19 }
  0x85   : > { %605 = vmatpush3.bf16.msk.msra.mxu0 %vm604_vm5, %v603_v8  ;;  %vm608_vm6 = vmpackc.low %vm248_vm4, %vm247_vm3  ;;  %v237_v26 = vadd.s32 72, %v974_v5  ;;  %vm253_vm13 = vcmp.lt.s32.totalorder %v236_v25, %v972_v4  ;;  %v238_v30 = vadd.s32 80, %v974_v5  ;;  %v239_v31 = vadd.s32 88, %v974_v5  ;;  %p747_p12 = pneg %p746_p11  ;;  %s750_s21 = scalar_lea.vmem %s749_s19, 256 }
  0x86   : > { %606 = vmatprep.subr.bf16.mxu0 %v831_v3  ;;  %vm612_vm9 = vmpackc.low %vm250_vm8, %vm249_vm7  ;;  %v619_v32 = vpack.c.bf16 %v220_v29, %v219_v28  ;;  %v240_v35 = vadd.s32 96, %v974_v5  ;;  %v241_v36 = vadd.s32 104, %v974_v5  ;;  %v623_v37 = vpack.c.bf16 %v222_v34, %v221_v33  ;;  %p751_p13 = scmp.lt.s32.totalorder %s1025_s15, %s749_s19  ;;  %p752_p0 = scmp.lt.s32.totalorder %s750_s21, %s744_s30 }
  0x87   : > { %vm616_vm12 = vmpackc.low %vm252_vm11, %vm251_vm10  ;;  %vm254_vm14 = vcmp.lt.s32.totalorder %v237_v26, %v972_v4  ;;  %vm255_vm0 = vcmp.lt.s32.totalorder %v238_v30, %v972_v4  ;;  %vm256_vm1 = vcmp.lt.s32.totalorder %v239_v31, %v972_v4  ;;  %v242_v40 = vadd.s32 112, %v974_v5 }
  0x88   : > { %vm620_vm15 = vmpackc.low %vm254_vm14, %vm253_vm13  ;;  %vm257_vm3 = vcmp.lt.s32.totalorder %v240_v35, %v972_v4  ;;  %vm258_vm4 = vcmp.lt.s32.totalorder %v241_v36, %v972_v4  ;;  %v243_v41 = vadd.s32 120, %v974_v5  ;;  %v627_v42 = vpack.c.bf16 %v224_v39, %v223_v38  ;;  %p753_p3 = por %p752_p0, %p751_p13 }
  0x89   : > { %609 = vmatpush3.bf16.msk.msra.mxu0 %vm608_vm6, %v607_v17  ;;  %vm624_vm2 = vmpackc.low %vm256_vm1, %vm255_vm0  ;;  %vm259_vm6 = vcmp.lt.s32.totalorder %v242_v40, %v972_v4  ;;  %v631_v45 = vpack.c.bf16 %v226_v44, %v225_v43 }
  0x8a   : > { %610 = vmatprep.subr.bf16.mxu0 %v831_v3  ;;  %vm628_vm5 = vmpackc.low %vm258_vm4, %vm257_vm3  ;;  %vm260_vm7 = vcmp.lt.s32.totalorder %v243_v41, %v972_v4  ;;  %p754_p4 = pnand %p753_p3, %p747_p12 }
  0x8b   : > { %vm632_vm8 = vmpackc.low %vm260_vm7, %vm259_vm6 }
  0x8d   : > { %613 = vmatpush3.bf16.msk.msra.mxu0 %vm612_vm9, %v611_v22 }
  0x8e   : > { %614 = vmatprep.subr.bf16.mxu0 %v831_v3 }
  0x91   : > { %617 = vmatpush3.bf16.msk.msra.mxu0 %vm616_vm12, %v615_v27 }
  0x92   : > { %618 = vmatprep.subr.bf16.mxu0 %v831_v3 }
  0x95   : > { %621 = vmatpush3.bf16.msk.msra.mxu0 %vm620_vm15, %v619_v32 }
  0x96   : > { %622 = vmatprep.subr.bf16.mxu0 %v831_v3 }
  0x99   : > { %625 = vmatpush3.bf16.msk.msra.mxu0 %vm624_vm2, %v623_v37 }
  0x9a   : > { %626 = vmatprep.subr.bf16.mxu0 %v831_v3 }
  0x9d   : > { %629 = vmatpush3.bf16.msk.msra.mxu0 %vm628_vm5, %v627_v42 }
  0x9e   : > { %630 = vmatprep.subr.bf16.mxu0 %v831_v3 }
  0xa1   : > { %633 = vmatpush3.bf16.msk.msra.mxu0 %vm632_vm8, %v631_v45 }
  0xa4   : > { %600 = vmatmul.mubr.f32.vlgmr.msra.gmra.mrb[0].mxu0 %v277_v46 }
  0xff   : > { %v352_v47 = vpop.permute.xlu0 %351 }
 0x177   : > { %v344_v48 = vpop.f32.mrb[0].mxu0 }
 0x178   : > { %v354_v49 = vmul.f32 %v352_v47, %v344_v48  ;;  %v601_v50 = vpop.f32.mrb[1].mxu0 }
 0x17a   : > { %355 = vst [vmem:[%s1091_s16] sm:$0xff] %v354_v49 }
 0x17b   : > { %757 = shalt.err (!%p754_p4)
}
 0x17c   : > { %s758_s14 = scalar_lea.hbm %s1023_s25, 128  ;;  %s762_s6 = scalar_lea.hbm %s1073_s5, 384 }
 0x17d   : > { %p759_p5 = scmp.ne.s32.totalorder %s1023_s25, %s758_s14  ;;  %p763_p8 = scmp.lt.u32.totalorder %s1023_s25, %s1073_s5 }
 0x17e   : > { %p764_p7 = scmp.lt.u32.totalorder %s762_s6, %s758_s14  ;;  %p766_p11 = scmp.lt.u32.totalorder %s758_s14, %s1023_s25 }
 0x17f   : > { %p760_p6 = pnand %p759_p5, %p910_p1 }
 0x180   : > { %p765_p10 = por %p764_p7, %p763_p8 }
 0x181   : > { %p761_p9 = pneg %p760_p6 }
 0x182   : > { %p767_p12 = por %p766_p11, %p765_p10 }
 0x184   : > { %p768_p13 = pnand %p767_p12, %p761_p9 }
 0x186   : > { %771 = shalt.err (!%p768_p13)
}
 0x187   : > { %634 = dma.vmem_to_hbm [thread:$0]  (%p910_p1), %s1025_s15, 128, %s1023_s25, %s357_s17  }
 0x188 PF: > { %p640_p0 = scmp.ge.s32.totalorder %s818_s29, 2  ;;  %s382_s8 = sand.u32 1, %s806_s1  }
 0x189   : > { %s383_s9 = scalar_lea.sflag [#allocation8], %s382_s8 }
 0x18a   : > { %p637_p3 = pnand %p640_p0, %p914_p2 }
 0x18c   : > { %801 = dma.done.wait (!%p637_p3), %s383_s9, 128  }
 0x18d   : > { %803 = vsyncadd (!%p637_p3), %s383_s9, 4294967168  ;;  %s1093_s29 = sld [smem:[#allocation17_spill]]  ;;  %s1094_s3 = sld [smem:[#allocation16_spill]] }
 0x18e   : > { %s1095_s28 = sld [smem:[#allocation18_spill]]  ;;  %s1096_s1 = smov %s810_s27 }
 0x193   : > { %p25_p4 = scmp.ge.s32.totalorder %s1093_s29, 5   ;;  %s1097_s27 = smov %s1094_s3 }
 0x195   :  { %27 = sbr.rel (!%p25_p4) target bundleno = 29 (0x1d), region = 117 }
 0x19c   :  { %388 = vsyncpa [#allocation8], 1 }
 0x19d   :  { %390 = vsyncpa [#allocation8 + $0x1], 1 }
 0x19e   :  { %391 = vsyncmov [#allocation3] }
 0x1a1   :  { %s392_s11 = vpop.sfrf %391 }
 0x1a2   :  { %p542_p1 = scmp.ne.s32.totalorder %s392_s11, 0 }
 0x1a4   :  { %396 = shalt.err (%p542_p1)  }
 0x1a5   :  { %398 = vsyncmov [#allocation3 + $0x1] }
 0x1a8   :  { %s399_s12 = vpop.sfrf %398 }
 0x1a9   :  { %p543_p2 = scmp.ne.s32.totalorder %s399_s12, 0 }
 0x1ab   :  { %403 = shalt.err (%p543_p2)  }
 0x1ac   :  { %405 = vsyncmov [#allocation3 + $0x2] }
 0x1af   :  { %s406_s7 = vpop.sfrf %405 }
 0x1b0   :  { %p544_p5 = scmp.ne.s32.totalorder %s406_s7, 0 }
 0x1b2   :  { %410 = shalt.err (%p544_p5)  }
 0x1b3   :  { %412 = vsyncmov [#allocation3 + $0x3] }
 0x1b6   :  { %s413_s2 = vpop.sfrf %412 }
 0x1b7   :  { %p545_p6 = scmp.ne.s32.totalorder %s413_s2, 0 }
 0x1b9   :  { %417 = shalt.err (%p545_p6)  }
 0x1ba   :  { %419 = vsyncmov [#allocation3 + $0x4] }
 0x1bd   :  { %s420_s29 = vpop.sfrf %419 }
 0x1be   :  { %p546_p9 = scmp.ne.s32.totalorder %s420_s29, 0 }
 0x1c0   :  { %424 = shalt.err (%p546_p9)  }
 0x1c1   :  { %426 = vsyncmov [#allocation3 + $0x5] }
 0x1c4   :  { %s427_s4 = vpop.sfrf %426 }
 0x1c5   :  { %p547_p8 = scmp.ne.s32.totalorder %s427_s4, 0 }
 0x1c7   :  { %431 = shalt.err (%p547_p8)  }
 0x1c8   :  { %433 = vsyncmov [#allocation3 + $0x6] }
 0x1cb   :  { %s434_s5 = vpop.sfrf %433 }
 0x1cc   :  { %p548_p7 = scmp.ne.s32.totalorder %s434_s5, 0 }
 0x1ce   :  { %438 = shalt.err (%p548_p7)  }
 0x1cf   :  { %440 = vsyncmov [#allocation3 + $0x7] }
 0x1d2   :  { %s441_s1 = vpop.sfrf %440 }
 0x1d3   :  { %p549_p10 = scmp.ne.s32.totalorder %s441_s1, 0 }
 0x1d5   :  { %445 = shalt.err (%p549_p10)  }

</bundles_post_ra>
